<compile_context>
chip_gen: v5e
topology: v5e:2x2
jax: 0.10.0
libtpu: 0.0.40
codegen_flags: <defaults>
</compile_context>

<pallas_src>
import functools

import jax
import jax.numpy as jnp
from jax.experimental import pallas as pl
from jax.experimental.pallas import tpu as pltpu


def _round_up(a, b):
    return (a + b - 1) // b * b


def _fc_bn_act_kernel(x_ref, w_ref, shift_ref, o_ref, acc_ref):
    k = pl.program_id(2)

    @pl.when(k == 0)
    def _():
        acc_ref[...] = jnp.zeros_like(acc_ref)

    # Hot path: MXU matmul accumulated in f32.
    acc_ref[...] += jnp.dot(x_ref[...], w_ref[...],
                            preferred_element_type=jnp.float32)

    @pl.when(k == pl.num_programs(2) - 1)
    def _():
        # Folded (bias + BN) shift, then ReLU. Scale was folded into W columns.
        y = acc_ref[...] + shift_ref[...]
        o_ref[...] = jnp.maximum(y, 0.0).astype(o_ref.dtype)


@functools.partial(jax.jit, static_argnames=("eps", "tm", "tn", "tk", "compute_dtype"))
def fc_bn_act(x, weight, bias, gamma, beta, running_mean, running_var,
              eps=1e-5, *, tm=256, tn=512, tk=512, compute_dtype=None):
    """x: (N, in_ch). weight: (out_ch, in_ch) (PyTorch layout). Returns (N, out_ch)."""
    n, in_ch = x.shape
    out_ch = weight.shape[0]

    # ---- Fold BN (eval mode) + linear bias into the weight / one shift vector.
    scale = gamma / jnp.sqrt(running_var + eps)            # (out_ch,)
    shift = beta - running_mean * scale + bias * scale     # (out_ch,)
    w_scaled = weight.T * scale[None, :]                   # (in_ch, out_ch)

    if compute_dtype is not None:                          # optional bf16 MXU path
        x = x.astype(compute_dtype)
        w_scaled = w_scaled.astype(compute_dtype)

    # ---- Pick tile sizes clamped to the (padded) problem, keep (8,128) legality.
    n_pad = _round_up(n, 8)
    tm = max(8, min(tm, n_pad))
    n_pad = _round_up(n_pad, tm)

    out_pad = _round_up(out_ch, 128)
    tn = max(128, min(tn, out_pad))
    out_pad = _round_up(out_pad, tn)

    in_pad = _round_up(in_ch, 128)
    tk = max(128, min(tk, in_pad))
    in_pad = _round_up(in_pad, tk)

    # ---- Zero-pad operands to tile multiples (padded lanes are sliced off).
    x_p = jnp.pad(x, ((0, n_pad - n), (0, in_pad - in_ch)))
    w_p = jnp.pad(w_scaled, ((0, in_pad - in_ch), (0, out_pad - out_ch)))
    shift_p = jnp.pad(shift.reshape(1, out_ch), ((0, 0), (0, out_pad - out_ch)))

    grid = (n_pad // tm, out_pad // tn, in_pad // tk)

    elem = jnp.dtype(x_p.dtype).itemsize
    vmem_bytes = (
        2 * (tm * tk + tk * tn + tn) * elem   # double-buffered inputs
        + 2 * tm * tn * elem                  # double-buffered output
        + tm * tn * 4                         # f32 accumulator scratch
    )
    vmem_limit = min(max(2 * vmem_bytes, 16 * 1024 * 1024), 48 * 1024 * 1024)

    cost = pl.CostEstimate(
        flops=2 * n_pad * in_pad * out_pad,
        transcendentals=0,
        bytes_accessed=(n_pad * in_pad + in_pad * out_pad + n_pad * out_pad) * elem,
    )

    out = pl.pallas_call(
        _fc_bn_act_kernel,
        out_shape=jax.ShapeDtypeStruct((n_pad, out_pad), jnp.float32),
        grid_spec=pltpu.PrefetchScalarGridSpec(
            num_scalar_prefetch=0,
            grid=grid,
            in_specs=[
                pl.BlockSpec((tm, tk), lambda i, j, k: (i, k)),   # x row/K tile
                pl.BlockSpec((tk, tn), lambda i, j, k: (k, j)),   # scaled weight tile
                pl.BlockSpec((1, tn), lambda i, j, k: (0, j)),    # folded shift
            ],
            out_specs=pl.BlockSpec((tm, tn), lambda i, j, k: (i, j)),
            scratch_shapes=[pltpu.VMEM((tm, tn), jnp.float32)],
        ),
        compiler_params=pltpu.CompilerParams(
            dimension_semantics=("parallel", "parallel", "arbitrary"),
            vmem_limit_bytes=vmem_limit,
        ),
        cost_estimate=cost,
    )(x_p, w_p, shift_p)

    return out[:n, :out_ch]


if __name__ == "__main__":
    key = jax.random.PRNGKey(0)
    N, IN_CH, OUT_CH = 16, 32, 64

    kx, kw, kb, kg, kbe, km, kv = jax.random.split(key, 7)
    x = jax.random.normal(kx, (N, IN_CH), dtype=jnp.float32)

    # Deterministic synthetic parameters (shapes from nn.Linear / nn.BatchNorm1d).
    weight = jax.random.normal(kw, (OUT_CH, IN_CH), dtype=jnp.float32) * 0.1
    bias = jax.random.normal(kb, (OUT_CH,), dtype=jnp.float32) * 0.1
    gamma = 1.0 + 0.1 * jax.random.normal(kg, (OUT_CH,), dtype=jnp.float32)
    beta = 0.1 * jax.random.normal(kbe, (OUT_CH,), dtype=jnp.float32)
    running_mean = 0.1 * jax.random.normal(km, (OUT_CH,), dtype=jnp.float32)
    running_var = 1.0 + 0.1 * jax.random.uniform(kv, (OUT_CH,), dtype=jnp.float32)

    out = fc_bn_act(x, weight, bias, gamma, beta, running_mean, running_var)
    out = jax.block_until_ready(out)

    # Pure-JAX reference (eval-mode BN).
    eps = 1e-5
    ref = x @ weight.T + bias
    ref = (ref - running_mean) / jnp.sqrt(running_var + eps) * gamma + beta
    ref = jnp.maximum(ref, 0.0)

    assert out.shape == (N, OUT_CH)
    assert jnp.allclose(out, ref, atol=1e-5, rtol=1e-5), "mismatch vs reference"
    print("KERNEL_OK")
</pallas_src>

<mosaic_0001>
module attributes {stable_mosaic.version = 11 : i64} {
  func.func @_fc_bn_act_kernel(%arg0: i32, %arg1: i32, %arg2: i32, %arg3: memref<16x128xf32, #tpu.memory_space<vmem>>, %arg4: memref<128x128xf32, #tpu.memory_space<vmem>>, %arg5: memref<1x128xf32, #tpu.memory_space<vmem>>, %arg6: memref<16x128xf32, #tpu.memory_space<vmem>>, %arg7: memref<16x128xf32, #tpu.memory_space<vmem>>) attributes {dimension_semantics = [#tpu.dimension_semantics<parallel>, #tpu.dimension_semantics<parallel>, #tpu.dimension_semantics<arbitrary>], iteration_bounds = array<i64: 1, 1, 1>, scalar_prefetch = 0 : i64, scratch_operands = 1 : i64, tpu.core_type = #tpu.core_type<tc>, window_params = [{transform_indices = @transform_0, window_bounds = array<i64: 16, 128>}, {transform_indices = @transform_1, window_bounds = array<i64: 128, 128>}, {transform_indices = @transform_2, window_bounds = array<i64: 1, 128>}, {transform_indices = @transform_3, window_bounds = array<i64: 16, 128>}]} {
    %c0_i32 = arith.constant 0 : i32
    %0 = arith.cmpi eq, %arg2, %c0_i32 : i32
    %1 = arith.extui %0 : i1 to i32
    %c0_i32_0 = arith.constant 0 : i32
    %2 = arith.cmpi ne, %1, %c0_i32_0 : i32
    scf.if %2 {
      %cst_10 = arith.constant 0.000000e+00 : f32
      %12 = vector.broadcast %cst_10 : f32 to vector<16x128xf32>
      %c0_11 = arith.constant 0 : index
      %c0_12 = arith.constant 0 : index
      %13 = vector.load %arg7[%c0_11, %c0_12] : memref<16x128xf32, #tpu.memory_space<vmem>>, vector<16x128xf32>
      tpu.vector_store %arg7[%c0_11, %c0_12], %12 {strides = array<i32>} : memref<16x128xf32, #tpu.memory_space<vmem>>, vector<16x128xf32>,
    } else {
    }
    %c0 = arith.constant 0 : index
    %c0_1 = arith.constant 0 : index
    %3 = vector.load %arg7[%c0, %c0_1] : memref<16x128xf32, #tpu.memory_space<vmem>>, vector<16x128xf32>
    %c0_2 = arith.constant 0 : index
    %c0_3 = arith.constant 0 : index
    %4 = vector.load %arg3[%c0_2, %c0_3] : memref<16x128xf32, #tpu.memory_space<vmem>>, vector<16x128xf32>
    %c0_4 = arith.constant 0 : index
    %c0_5 = arith.constant 0 : index
    %5 = vector.load %arg4[%c0_4, %c0_5] : memref<128x128xf32, #tpu.memory_space<vmem>>, vector<128x128xf32>
    %cst = arith.constant dense<0.000000e+00> : vector<16x128xf32>
    %6 = tpu.matmul %4, %5, %cst {dimension_numbers = #tpu.dot_dimension_numbers<[1], [0], [0], [1], [0, 0, 1, 1], [], []>} : vector<16x128xf32>, vector<128x128xf32>, vector<16x128xf32> -> vector<16x128xf32>
    %7 = arith.addf %3, %6 : vector<16x128xf32>
    %c0_6 = arith.constant 0 : index
    %c0_7 = arith.constant 0 : index
    %8 = vector.load %arg7[%c0_6, %c0_7] : memref<16x128xf32, #tpu.memory_space<vmem>>, vector<16x128xf32>
    tpu.vector_store %arg7[%c0_6, %c0_7], %7 {strides = array<i32>} : memref<16x128xf32, #tpu.memory_space<vmem>>, vector<16x128xf32>,
    %c0_i32_8 = arith.constant 0 : i32
    %9 = arith.cmpi eq, %arg2, %c0_i32_8 : i32
    %10 = arith.extui %9 : i1 to i32
    %c0_i32_9 = arith.constant 0 : i32
    %11 = arith.cmpi ne, %10, %c0_i32_9 : i32
    scf.if %11 {
      %c0_10 = arith.constant 0 : index
      %c0_11 = arith.constant 0 : index
      %12 = vector.load %arg7[%c0_10, %c0_11] : memref<16x128xf32, #tpu.memory_space<vmem>>, vector<16x128xf32>
      %c0_12 = arith.constant 0 : index
      %c0_13 = arith.constant 0 : index
      %13 = vector.load %arg5[%c0_12, %c0_13] : memref<1x128xf32, #tpu.memory_space<vmem>>, vector<1x128xf32>
      %14 = vector.broadcast %13 : vector<1x128xf32> to vector<16x128xf32>
      %15 = arith.addf %12, %14 : vector<16x128xf32>
      %cst_14 = arith.constant 0.000000e+00 : f32
      %16 = vector.broadcast %cst_14 : f32 to vector<16x128xf32>
      %17 = arith.maximumf %15, %16 : vector<16x128xf32>
      %c0_15 = arith.constant 0 : index
      %c0_16 = arith.constant 0 : index
      %18 = vector.load %arg6[%c0_15, %c0_16] : memref<16x128xf32, #tpu.memory_space<vmem>>, vector<16x128xf32>
      tpu.vector_store %arg6[%c0_15, %c0_16], %17 {strides = array<i32>} : memref<16x128xf32, #tpu.memory_space<vmem>>, vector<16x128xf32>,
    } else {
    }
    return
  }
  func.func @transform_0(%arg0: i32, %arg1: i32, %arg2: i32) -> (i32, i32) {
    %c0_i32 = arith.constant 0 : i32
    return %arg0, %arg2 : i32, i32
  }
  func.func @transform_1(%arg0: i32, %arg1: i32, %arg2: i32) -> (i32, i32) {
    %c0_i32 = arith.constant 0 : i32
    return %arg2, %arg1 : i32, i32
  }
  func.func @transform_2(%arg0: i32, %arg1: i32, %arg2: i32) -> (i32, i32) {
    %c0_i32 = arith.constant 0 : i32
    %c0_i32_0 = arith.constant 0 : i32
    return %c0_i32, %arg1 : i32, i32
  }
  func.func @transform_3(%arg0: i32, %arg1: i32, %arg2: i32) -> (i32, i32) {
    %c0_i32 = arith.constant 0 : i32
    return %arg0, %arg1 : i32, i32
  }
}

</mosaic_0001>

<bundles_post_ra>
// kernel: fc_bn_act.1
= control target key start
LH: loop header
LB: loop body
LE: loop exit
PB: predicated region body
PF: predicated region fallthrough
CT: control target
= control target key end

     0   :  { %s230_s0 = inlined_call_operand.vmem [shape: f32[16,128], index: 0, kind: input, shape index: {}]   ;;  %s231_s1 = inlined_call_operand.vmem [shape: f32[128,128], index: 1, kind: input, shape index: {}]   ;;  %s232_s2 = inlined_call_operand.vmem [shape: f32[1,128], index: 2, kind: input, shape index: {}]   ;;  %s233_s3 = inlined_call_operand.hbm [shape: f32[16,128], index: 3, kind: output, shape index: {}]  }
   0x1   :  { %v40_v0 = vld [vmem:[%s231_s1 + $0x78] sm:$0xff]  ;;  %v39_v1 = vld [vmem:[%s231_s1 + $0x70] sm:$0xff]  ;;  %v38_v2 = vld [vmem:[%s231_s1 + $0x68] sm:$0xff] }
   0x2   :  { %41 = vmatpush.msra.mxu0 %v40_v0  ;;  %101 = vmatpush.msra.mxu1 %v40_v0  ;;  %v37_v3 = vld [vmem:[%s231_s1 + $0x60] sm:$0xff]  ;;  %v36_v4 = vld [vmem:[%s231_s1 + $0x58] sm:$0xff] }
   0x4   :  { %42 = vmatpush.msra.mxu0 %v39_v1  ;;  %102 = vmatpush.msra.mxu1 %v39_v1 }
   0x6   :  { %43 = vmatpush.msra.mxu0 %v38_v2  ;;  %103 = vmatpush.msra.mxu1 %v38_v2 }
   0x7   :  { %8 = vsyncpa [#allocation4], 0  ;;  %v35_v5 = vld [vmem:[%s231_s1 + $0x50] sm:$0xff]  ;;  %v34_v6 = vld [vmem:[%s231_s1 + $0x48] sm:$0xff]  ;;  %s89_s26 = sshll.u32 %s233_s3, 4  ;;  %s149_s27 = smov 8   ;;  %s90_s26 = int_to_ptr.hbm [resolvable:$true] %s89_s26 }
   0x8   :  { %44 = vmatpush.msra.mxu0 %v37_v3  ;;  %104 = vmatpush.msra.mxu1 %v37_v3  ;;  %v33_v7 = vld [vmem:[%s231_s1 + $0x40] sm:$0xff]  ;;  %v32_v8 = vld [vmem:[%s231_s1 + $0x38] sm:$0xff]  ;;  %v31_v9 = vld [vmem:[%s231_s1 + $0x30] sm:$0xff] }
   0x9   :  { %v30_v10 = vld [vmem:[%s231_s1 + $0x28] sm:$0xff]  ;;  %v29_v11 = vld [vmem:[%s231_s1 + $0x20] sm:$0xff]  ;;  %v28_v12 = vld [vmem:[%s231_s1 + $0x18] sm:$0xff] }
   0xa   :  { %45 = vmatpush.msra.mxu0 %v36_v4  ;;  %105 = vmatpush.msra.mxu1 %v36_v4  ;;  %v27_v13 = vld [vmem:[%s231_s1 + $0x10] sm:$0xff]  ;;  %v26_v14 = vld [vmem:[%s231_s1 + $0x8] sm:$0xff]  ;;  %v25_v15 = vld [vmem:[%s231_s1] sm:$0xff]  ;;  %s147_s1 = smov [#allocation3]  }
   0xb   :  { %v23_v16 = vld [vmem:[%s230_s0] sm:$0xff]  ;;  %v24_v17 = vld [vmem:[%s230_s0 + $0x8] sm:$0xff]  ;;  %s87_s23 = sshll.u32 %s147_s1, 4  ;;  %s148_s0 = smov 128   ;;  %s88_s23 = int_to_ptr.vmem [resolvable:$true] %s87_s23 }
   0xc   :  { %46 = vmatpush.msra.mxu0 %v35_v5  ;;  %106 = vmatpush.msra.mxu1 %v35_v5  ;;  %v120_v18 = vld [vmem:[%s232_s2] ss:$0 sm:$0xff] }
   0xe   :  { %47 = vmatpush.msra.mxu0 %v34_v6  ;;  %107 = vmatpush.msra.mxu1 %v34_v6 }
  0x10   :  { %48 = vmatpush.msra.mxu0 %v33_v7  ;;  %108 = vmatpush.msra.mxu1 %v33_v7 }
  0x12   :  { %49 = vmatpush.msra.mxu0 %v32_v8  ;;  %109 = vmatpush.msra.mxu1 %v32_v8 }
  0x14   :  { %50 = vmatpush.msra.mxu0 %v31_v9  ;;  %110 = vmatpush.msra.mxu1 %v31_v9 }
  0x16   :  { %51 = vmatpush.msra.mxu0 %v30_v10  ;;  %111 = vmatpush.msra.mxu1 %v30_v10 }
  0x18   :  { %52 = vmatpush.msra.mxu0 %v29_v11  ;;  %112 = vmatpush.msra.mxu1 %v29_v11 }
  0x1a   :  { %53 = vmatpush.msra.mxu0 %v28_v12  ;;  %113 = vmatpush.msra.mxu1 %v28_v12 }
  0x1c   :  { %54 = vmatpush.msra.mxu0 %v27_v13  ;;  %114 = vmatpush.msra.mxu1 %v27_v13 }
  0x1e   :  { %55 = vmatpush.msra.mxu0 %v26_v14  ;;  %115 = vmatpush.msra.mxu1 %v26_v14 }
  0x20   :  { %56 = vmatpush.msra.mxu0 %v25_v15  ;;  %116 = vmatpush.msra.mxu1 %v25_v15 }
  0x21   :  { %57 = vmatmul.f32.vlgmr.msra.gmra.mxu0 %v23_v16  ;;  %60 = vmatmul.f32.vlgmr.msra.gmra.mxu1 %v24_v17 }
  0x9e   :  { %v58_v19 = vpop.f32.mrf.mxu0  ;;  %v61_v20 = vpop.f32.mrf.mxu1 }
  0x9f   :  { %v77_v21 = vadd.f32 %v120_v18, %v58_v19  ;;  %v78_v22 = vadd.f32 %v120_v18, %v61_v20 }
  0xa1   :  { %v79_v23 = vmax.f32 %v77_v21, 0.0  ;;  %v80_v24 = vmax.f32 %v78_v22, 0.0 }
  0xa3   :  { %81 = vst [vmem:[#allocation3] sm:$0xff] %v79_v23 }
  0xa4   :  { %82 = vst [vmem:[#allocation3 + $0x8] sm:$0xff] %v80_v24 }
  0xa5   :  { %95 = dma.vmem_to_hbm [thread:$0]  %s88_s23, 256, %s90_s26, [#allocation4], %s148_s0, %s148_s0, %s149_s27  }
  0xa6   :  { %145 = dma.done.wait [#allocation4], 256  }
  0xa7   :  { %146 = vsyncadd [#allocation4], 4294967040 }
  0xa8   :  { %100 = vsyncpa [#allocation4], 1 }

</bundles_post_ra>
